<compile_context>
chip_gen: v6e
topology: v6e:2x2x1
jax: 0.10.0
libtpu: 0.0.40
codegen_flags: <defaults>
</compile_context>

<pallas_src>
import jax
import jax.numpy as jnp
from jax.experimental import pallas as pl
from jax.experimental.pallas import tpu as pltpu


def _hbm_copy_kernel(x_hbm, o_hbm, sem):
    # TODO(synk): FCDecoder.forward performs no computation (returns None);
    # this kernel is a pass-through placeholder kept only so the Pallas path
    # is exercised.  It is a single whole-array HBM->HBM DMA: no VMEM
    # pipeline, no vld/vst bundles, no (8,128) tiling constraints.
    cp = pltpu.make_async_copy(x_hbm, o_hbm, sem)
    cp.start()
    cp.wait()


@jax.jit
def identity_pallas(x):
    """Identity over an arbitrary-shape array via one HBM->HBM DMA.

    Generation-portable: no VMEM blocks are allocated, so v5e's 16 MiB /
    v6e-v7x's 32 MiB scoped-VMEM defaults and v7x's 64 MiB physical VMEM are
    irrelevant, and odd / unaligned shapes need no padding or slicing.
    """
    return pl.pallas_call(
        _hbm_copy_kernel,
        out_shape=jax.ShapeDtypeStruct(x.shape, x.dtype),
        in_specs=[pl.BlockSpec(memory_space=pl.ANY)],
        out_specs=pl.BlockSpec(memory_space=pl.ANY),
        scratch_shapes=[pltpu.SemaphoreType.DMA(())],
    )(x)


class FCDecoder:
    """JAX/Pallas port of models.decoder.FCDecoder (no params, forward -> None)."""

    def __init__(self, cfg=None):
        # Reference __init__ registers no parameters; nothing to initialize.
        pass

    def forward(self, X):
        # Exact semantics of the PyTorch module: always returns None.
        return None

    __call__ = forward


def fc_decoder_forward(x):
    """Faithful forward: returns None, matching torch FCDecoder.forward."""
    return FCDecoder()(x)


if __name__ == "__main__":
    key = jax.random.PRNGKey(0)

    # Small NCHW input consistent with a decoder-style module.
    B, C, H, W = 2, 4, 16, 16
    x = jax.random.normal(key, (B, C, H, W), dtype=jnp.float32)

    # Faithful module semantics: output is None.
    out = fc_decoder_forward(x)
    assert out is None, "FCDecoder.forward must return None"

    # Exercise the Pallas kernel once on a fixed tiny (8, 128) buffer — O(1)
    # launch overhead independent of the decoder input size.
    dkey = jax.random.PRNGKey(0)
    dummy = jax.random.normal(dkey, (8, 128), dtype=jnp.float32)
    y = jax.block_until_ready(identity_pallas(dummy))
    assert jnp.allclose(y, dummy), "HBM->HBM DMA identity mismatch (aligned)"

    # Also run it on the raw 4-D decoder input (last dim 16, not a multiple
    # of 128) to demonstrate the no-padding / no-slicing path is exact.
    y4 = jax.block_until_ready(identity_pallas(x))
    assert jnp.allclose(y4, x), "HBM->HBM DMA identity mismatch (unaligned)"

    print("KERNEL_OK")
</pallas_src>

<mosaic_0001>
module attributes {stable_mosaic.version = 11 : i64} {
  func.func @_hbm_copy_kernel(%arg0: memref<8x128xf32, #tpu.memory_space<any>>, %arg1: memref<8x128xf32, #tpu.memory_space<any>>, %arg2: memref<!tpu.dma_semaphore, #tpu.memory_space<semaphore_mem>>) attributes {dimension_semantics = [], scalar_prefetch = 0 : i64, scratch_operands = 1 : i64, tpu.core_type = #tpu.core_type<tc>} {
    tpu.enqueue_dma source(%arg0 : memref<8x128xf32, #tpu.memory_space<any>>) target(%arg1 : memref<8x128xf32, #tpu.memory_space<any>>) target_semaphore(%arg2 : memref<!tpu.dma_semaphore, #tpu.memory_space<semaphore_mem>>)
    tpu.wait_dma2 semaphore(%arg2 : memref<!tpu.dma_semaphore, #tpu.memory_space<semaphore_mem>>) src(%arg0 : memref<8x128xf32, #tpu.memory_space<any>>) dst(%arg1 : memref<8x128xf32, #tpu.memory_space<any>>)
    return
  }
}

</mosaic_0001>

<bundles_post_ra>
// kernel: identity_pallas.1
= control target key start
LH: loop header
LB: loop body
LE: loop exit
PB: predicated region body
PF: predicated region fallthrough
CT: control target
= control target key end

     0   :  { %s28_s6 = smov [#allocation2]   ;;  %s29_s7 = smov 131072   ;;  %s47_s0 = inlined_call_operand.hbm [shape: f32[8,128], index: 0, kind: input, shape index: {}]   ;;  %s48_s1 = inlined_call_operand.hbm [shape: f32[8,128], index: 1, kind: output, shape index: {}]  }
   0x1   :  { %s30_s8 = smov 0  }
   0x2   :  { %12 = dma.general %s47_s0, 128, %s48_s1, %s28_s6, %s29_s7, [#allocation4], %s30_s8, 0  }
   0x3   :  { %26 = dma.done.wait [#allocation2], 128 }
   0x4   :  { %27 = vsyncadd [#allocation2], 4294967168 }
   0x5   :  { %16 = vsyncmov [#allocation2] }
   0x8   :  { %s17_s13 = vpop.sfrf %16 }
   0x9   :  { %p22_p0 = scmp.ne.s32.totalorder %s17_s13, 0 }
   0xb   :  { %21 = shalt.err (%p22_p0)  }

</bundles_post_ra>
